<compile_context>
chip_gen: v6e
topology: v6e:2x2x1
jax: 0.10.0
libtpu: 0.0.40
codegen_flags: <defaults>
</compile_context>

<pallas_src>
import math
import functools

import jax
import jax.numpy as jnp
from jax import lax
from jax.experimental import pallas as pl
from jax.experimental.pallas import tpu as pltpu


def _mha_kernel(x_ref, w_ref, o_ref, *, num_heads, head_dim, norm):
    # x_ref: (1, S, E)   current batch element
    # w_ref: (E, 3*H*hd) fused [Wq | Wk | Wv] projection (x @ W form)
    # o_ref: (1, S, H*hd) lane-dense output (heads packed along lanes)
    H, hd = num_heads, head_dim
    hh = H * hd

    x = x_ref[0]                                                   # (S, E)
    qkv = jnp.dot(x, w_ref[...], preferred_element_type=jnp.float32)  # (S, 3*H*hd)

    # Fold the 1/sqrt(hd) scale into q (cheaper than scaling (S, S) scores).
    q = qkv[:, 0 * hh:1 * hh] * norm                               # (S, H*hd)
    k = qkv[:, 1 * hh:2 * hh]                                      # (S, H*hd)
    v = qkv[:, 2 * hh:3 * hh]                                      # (S, H*hd)

    outs = []
    for h in range(H):                                             # static unroll, H small
        qh = q[:, h * hd:(h + 1) * hd]                             # (S, hd)
        kh = k[:, h * hd:(h + 1) * hd]                             # (S, hd)
        vh = v[:, h * hd:(h + 1) * hd]                             # (S, hd)

        # scores = qh @ kh^T without an explicit transpose: contract last dims.
        s = lax.dot_general(
            qh, kh,
            dimension_numbers=(((1,), (1,)), ((), ())),
            preferred_element_type=jnp.float32,
        )                                                          # (S, S)

        # numerically-stable softmax along the last axis (F.softmax(dim=-1))
        s = s - jnp.max(s, axis=-1, keepdims=True)
        p = jnp.exp(s)
        p = p * pl.reciprocal(jnp.sum(p, axis=-1, keepdims=True), approx=True)

        outs.append(jnp.dot(p, vh, preferred_element_type=jnp.float32))  # (S, hd)

    # One lane-dense store of the full (S, H*hd) row block.
    o_ref[0] = jnp.concatenate(outs, axis=-1).astype(o_ref.dtype)


def multi_head_attention(x, wq, wk, wv, *, num_heads, head_dim):
    """x: (B, S, E); wq/wk/wv: (E, H*hd) in x @ W form (nn.Linear weight^T).

    Returns (out, attention) matching the PyTorch module:
      out:       (B, S, H*hd)
      attention: (B, H, S, hd)
    """
    B, S, E = x.shape
    H, hd = num_heads, head_dim
    hh = H * hd
    norm = 1.0 / math.sqrt(hd)

    # Fuse the three projections into a single MXU-friendly matrix.
    w_qkv = jnp.concatenate([wq, wk, wv], axis=-1)                 # (E, 3*H*hd)

    kernel = functools.partial(
        _mha_kernel, num_heads=H, head_dim=hd, norm=norm
    )

    out = pl.pallas_call(
        kernel,
        out_shape=jax.ShapeDtypeStruct((B, S, hh), jnp.float32),
        grid_spec=pltpu.PrefetchScalarGridSpec(
            num_scalar_prefetch=0,
            grid=(B,),
            in_specs=[
                pl.BlockSpec((1, S, E), lambda b: (b, 0, 0)),      # x, per batch
                pl.BlockSpec((E, 3 * hh), lambda b: (0, 0)),       # fused W, whole array
            ],
            out_specs=pl.BlockSpec((1, S, hh), lambda b: (b, 0, 0)),
        ),
        compiler_params=pltpu.CompilerParams(
            dimension_semantics=("parallel",),                     # one batch per TC on v7x
        ),
    )(x, w_qkv)

    # attention (B, H, S, hd) is a pure re-layout of the lane-dense kernel out.
    attention = jnp.transpose(out.reshape(B, S, H, hd), (0, 2, 1, 3))
    return out, attention


def _reference(x, wq, wk, wv, num_heads, head_dim):
    """Pure-JAX reference mirroring the PyTorch forward."""
    B, S, E = x.shape
    H, hd = num_heads, head_dim
    q = (x @ wq).reshape(B, S, H, hd).transpose(0, 2, 1, 3)
    k = (x @ wk).reshape(B, S, H, hd).transpose(0, 2, 1, 3)
    v = (x @ wv).reshape(B, S, H, hd).transpose(0, 2, 1, 3)
    scores = jnp.einsum("bhqd,bhkd->bhqk", q, k) / math.sqrt(hd)
    attn_w = jax.nn.softmax(scores, axis=-1)
    attention = jnp.einsum("bhqk,bhkd->bhqd", attn_w, v)
    out = jnp.transpose(attention, (0, 2, 1, 3)).reshape(B, S, H * hd)
    return out, attention


if __name__ == "__main__":
    # module hyperparams (small, consistent with the forward)
    embedding_size = 32
    num_heads = 4
    attention_head_size = 32
    head_dim = attention_head_size // num_heads

    batch, seq = 2, 8

    key = jax.random.PRNGKey(0)
    kx, kq, kk, kv = jax.random.split(key, 4)

    x = jax.random.normal(kx, (batch, seq, embedding_size), dtype=jnp.float32)

    # Deterministic weight init. PyTorch nn.Linear weight is (out, in); we
    # build the transposed (in, out) = (E, H*hd) form directly.
    def init_w(k):
        return jax.random.normal(
            k, (embedding_size, attention_head_size), dtype=jnp.float32
        ) * (1.0 / math.sqrt(embedding_size))

    wq = init_w(kq)
    wk = init_w(kk)
    wv = init_w(kv)

    out, attention = multi_head_attention(
        x, wq, wk, wv, num_heads=num_heads, head_dim=head_dim
    )
    jax.block_until_ready((out, attention))

    out_ref, attn_ref = _reference(x, wq, wk, wv, num_heads, head_dim)
    assert out.shape == (batch, seq, attention_head_size)
    assert attention.shape == (batch, num_heads, seq, head_dim)
    # Tolerance loosened for pl.reciprocal(approx=True) in the softmax denom.
    assert jnp.allclose(out, out_ref, atol=1e-2, rtol=1e-2)
    assert jnp.allclose(attention, attn_ref, atol=1e-2, rtol=1e-2)

    print("KERNEL_OK")
</pallas_src>

<mosaic_0001>
module attributes {stable_mosaic.version = 11 : i64} {
  func.func @_mha_kernel(%arg0: i32, %arg1: memref<1x8x32xf32, #tpu.memory_space<vmem>>, %arg2: memref<32x96xf32, #tpu.memory_space<vmem>>, %arg3: memref<1x8x32xf32, #tpu.memory_space<vmem>>) attributes {dimension_semantics = [#tpu.dimension_semantics<parallel>], iteration_bounds = array<i64: 2>, scalar_prefetch = 0 : i64, scratch_operands = 0 : i64, tpu.core_type = #tpu.core_type<tc>, window_params = [{transform_indices = @transform_0, window_bounds = array<i64: 1, 8, 32>}, {pipeline_mode = #tpu.pipeline_mode<synchronous>, transform_indices = @transform_1, window_bounds = array<i64: 32, 96>}, {transform_indices = @transform_2, window_bounds = array<i64: 1, 8, 32>}]} {
    %c0 = arith.constant 0 : index
    %c0_0 = arith.constant 0 : index
    %c0_1 = arith.constant 0 : index
    %0 = vector.load %arg1[%c0, %c0_0, %c0_1] : memref<1x8x32xf32, #tpu.memory_space<vmem>>, vector<1x8x32xf32>
    %1 = vector.shape_cast %0 : vector<1x8x32xf32> to vector<8x32xf32>
    %c0_2 = arith.constant 0 : index
    %c0_3 = arith.constant 0 : index
    %2 = vector.load %arg2[%c0_2, %c0_3] : memref<32x96xf32, #tpu.memory_space<vmem>>, vector<32x96xf32>
    %cst = arith.constant dense<0.000000e+00> : vector<8x96xf32>
    %3 = tpu.matmul %1, %2, %cst {dimension_numbers = #tpu.dot_dimension_numbers<[1], [0], [0], [1], [0, 0, 1, 1], [], []>} : vector<8x32xf32>, vector<32x96xf32>, vector<8x96xf32> -> vector<8x96xf32>
    %4 = vector.extract_strided_slice %3 {offsets = [0, 0], sizes = [8, 32], strides = [1, 1]} : vector<8x96xf32> to vector<8x32xf32>
    %cst_4 = arith.constant 0.353553385 : f32
    %5 = vector.broadcast %cst_4 : f32 to vector<8x32xf32>
    %6 = arith.mulf %4, %5 : vector<8x32xf32>
    %7 = vector.extract_strided_slice %3 {offsets = [0, 32], sizes = [8, 32], strides = [1, 1]} : vector<8x96xf32> to vector<8x32xf32>
    %8 = vector.extract_strided_slice %3 {offsets = [0, 64], sizes = [8, 32], strides = [1, 1]} : vector<8x96xf32> to vector<8x32xf32>
    %9 = vector.extract_strided_slice %6 {offsets = [0, 0], sizes = [8, 8], strides = [1, 1]} : vector<8x32xf32> to vector<8x8xf32>
    %10 = vector.extract_strided_slice %7 {offsets = [0, 0], sizes = [8, 8], strides = [1, 1]} : vector<8x32xf32> to vector<8x8xf32>
    %11 = vector.extract_strided_slice %8 {offsets = [0, 0], sizes = [8, 8], strides = [1, 1]} : vector<8x32xf32> to vector<8x8xf32>
    %cst_5 = arith.constant dense<0.000000e+00> : vector<8x8xf32>
    %12 = tpu.matmul %9, %10, %cst_5 {dimension_numbers = #tpu.dot_dimension_numbers<[1], [1], [0], [0], [0, 0, 1, 0], [], []>} : vector<8x8xf32>, vector<8x8xf32>, vector<8x8xf32> -> vector<8x8xf32>
    %cst_6 = arith.constant dense<0xFF800000> : vector<8xf32>
    %13 = vector.multi_reduction <maximumf>, %12, %cst_6 [1] : vector<8x8xf32> to vector<8xf32>
    %14 = vector.shape_cast %13 : vector<8xf32> to vector<8x1xf32>
    %15 = vector.broadcast %14 : vector<8x1xf32> to vector<8x8xf32>
    %16 = arith.subf %12, %15 : vector<8x8xf32>
    %17 = math.exp %16 : vector<8x8xf32>
    %cst_7 = arith.constant dense<0.000000e+00> : vector<8xf32>
    %18 = vector.multi_reduction <add>, %17, %cst_7 [1] : vector<8x8xf32> to vector<8xf32>
    %19 = vector.shape_cast %18 : vector<8xf32> to vector<8x1xf32>
    %20 = tpu.reciprocal %19 {approx = true} : vector<8x1xf32> -> vector<8x1xf32>
    %21 = vector.broadcast %20 : vector<8x1xf32> to vector<8x8xf32>
    %22 = arith.mulf %17, %21 : vector<8x8xf32>
    %cst_8 = arith.constant dense<0.000000e+00> : vector<8x8xf32>
    %23 = tpu.matmul %22, %11, %cst_8 {dimension_numbers = #tpu.dot_dimension_numbers<[1], [0], [0], [1], [0, 0, 1, 1], [], []>} : vector<8x8xf32>, vector<8x8xf32>, vector<8x8xf32> -> vector<8x8xf32>
    %24 = vector.extract_strided_slice %6 {offsets = [0, 8], sizes = [8, 8], strides = [1, 1]} : vector<8x32xf32> to vector<8x8xf32>
    %25 = vector.extract_strided_slice %7 {offsets = [0, 8], sizes = [8, 8], strides = [1, 1]} : vector<8x32xf32> to vector<8x8xf32>
    %26 = vector.extract_strided_slice %8 {offsets = [0, 8], sizes = [8, 8], strides = [1, 1]} : vector<8x32xf32> to vector<8x8xf32>
    %cst_9 = arith.constant dense<0.000000e+00> : vector<8x8xf32>
    %27 = tpu.matmul %24, %25, %cst_9 {dimension_numbers = #tpu.dot_dimension_numbers<[1], [1], [0], [0], [0, 0, 1, 0], [], []>} : vector<8x8xf32>, vector<8x8xf32>, vector<8x8xf32> -> vector<8x8xf32>
    %cst_10 = arith.constant dense<0xFF800000> : vector<8xf32>
    %28 = vector.multi_reduction <maximumf>, %27, %cst_10 [1] : vector<8x8xf32> to vector<8xf32>
    %29 = vector.shape_cast %28 : vector<8xf32> to vector<8x1xf32>
    %30 = vector.broadcast %29 : vector<8x1xf32> to vector<8x8xf32>
    %31 = arith.subf %27, %30 : vector<8x8xf32>
    %32 = math.exp %31 : vector<8x8xf32>
    %cst_11 = arith.constant dense<0.000000e+00> : vector<8xf32>
    %33 = vector.multi_reduction <add>, %32, %cst_11 [1] : vector<8x8xf32> to vector<8xf32>
    %34 = vector.shape_cast %33 : vector<8xf32> to vector<8x1xf32>
    %35 = tpu.reciprocal %34 {approx = true} : vector<8x1xf32> -> vector<8x1xf32>
    %36 = vector.broadcast %35 : vector<8x1xf32> to vector<8x8xf32>
    %37 = arith.mulf %32, %36 : vector<8x8xf32>
    %cst_12 = arith.constant dense<0.000000e+00> : vector<8x8xf32>
    %38 = tpu.matmul %37, %26, %cst_12 {dimension_numbers = #tpu.dot_dimension_numbers<[1], [0], [0], [1], [0, 0, 1, 1], [], []>} : vector<8x8xf32>, vector<8x8xf32>, vector<8x8xf32> -> vector<8x8xf32>
    %39 = vector.extract_strided_slice %6 {offsets = [0, 16], sizes = [8, 8], strides = [1, 1]} : vector<8x32xf32> to vector<8x8xf32>
    %40 = vector.extract_strided_slice %7 {offsets = [0, 16], sizes = [8, 8], strides = [1, 1]} : vector<8x32xf32> to vector<8x8xf32>
    %41 = vector.extract_strided_slice %8 {offsets = [0, 16], sizes = [8, 8], strides = [1, 1]} : vector<8x32xf32> to vector<8x8xf32>
    %cst_13 = arith.constant dense<0.000000e+00> : vector<8x8xf32>
    %42 = tpu.matmul %39, %40, %cst_13 {dimension_numbers = #tpu.dot_dimension_numbers<[1], [1], [0], [0], [0, 0, 1, 0], [], []>} : vector<8x8xf32>, vector<8x8xf32>, vector<8x8xf32> -> vector<8x8xf32>
    %cst_14 = arith.constant dense<0xFF800000> : vector<8xf32>
    %43 = vector.multi_reduction <maximumf>, %42, %cst_14 [1] : vector<8x8xf32> to vector<8xf32>
    %44 = vector.shape_cast %43 : vector<8xf32> to vector<8x1xf32>
    %45 = vector.broadcast %44 : vector<8x1xf32> to vector<8x8xf32>
    %46 = arith.subf %42, %45 : vector<8x8xf32>
    %47 = math.exp %46 : vector<8x8xf32>
    %cst_15 = arith.constant dense<0.000000e+00> : vector<8xf32>
    %48 = vector.multi_reduction <add>, %47, %cst_15 [1] : vector<8x8xf32> to vector<8xf32>
    %49 = vector.shape_cast %48 : vector<8xf32> to vector<8x1xf32>
    %50 = tpu.reciprocal %49 {approx = true} : vector<8x1xf32> -> vector<8x1xf32>
    %51 = vector.broadcast %50 : vector<8x1xf32> to vector<8x8xf32>
    %52 = arith.mulf %47, %51 : vector<8x8xf32>
    %cst_16 = arith.constant dense<0.000000e+00> : vector<8x8xf32>
    %53 = tpu.matmul %52, %41, %cst_16 {dimension_numbers = #tpu.dot_dimension_numbers<[1], [0], [0], [1], [0, 0, 1, 1], [], []>} : vector<8x8xf32>, vector<8x8xf32>, vector<8x8xf32> -> vector<8x8xf32>
    %54 = vector.extract_strided_slice %6 {offsets = [0, 24], sizes = [8, 8], strides = [1, 1]} : vector<8x32xf32> to vector<8x8xf32>
    %55 = vector.extract_strided_slice %7 {offsets = [0, 24], sizes = [8, 8], strides = [1, 1]} : vector<8x32xf32> to vector<8x8xf32>
    %56 = vector.extract_strided_slice %8 {offsets = [0, 24], sizes = [8, 8], strides = [1, 1]} : vector<8x32xf32> to vector<8x8xf32>
    %cst_17 = arith.constant dense<0.000000e+00> : vector<8x8xf32>
    %57 = tpu.matmul %54, %55, %cst_17 {dimension_numbers = #tpu.dot_dimension_numbers<[1], [1], [0], [0], [0, 0, 1, 0], [], []>} : vector<8x8xf32>, vector<8x8xf32>, vector<8x8xf32> -> vector<8x8xf32>
    %cst_18 = arith.constant dense<0xFF800000> : vector<8xf32>
    %58 = vector.multi_reduction <maximumf>, %57, %cst_18 [1] : vector<8x8xf32> to vector<8xf32>
    %59 = vector.shape_cast %58 : vector<8xf32> to vector<8x1xf32>
    %60 = vector.broadcast %59 : vector<8x1xf32> to vector<8x8xf32>
    %61 = arith.subf %57, %60 : vector<8x8xf32>
    %62 = math.exp %61 : vector<8x8xf32>
    %cst_19 = arith.constant dense<0.000000e+00> : vector<8xf32>
    %63 = vector.multi_reduction <add>, %62, %cst_19 [1] : vector<8x8xf32> to vector<8xf32>
    %64 = vector.shape_cast %63 : vector<8xf32> to vector<8x1xf32>
    %65 = tpu.reciprocal %64 {approx = true} : vector<8x1xf32> -> vector<8x1xf32>
    %66 = vector.broadcast %65 : vector<8x1xf32> to vector<8x8xf32>
    %67 = arith.mulf %62, %66 : vector<8x8xf32>
    %cst_20 = arith.constant dense<0.000000e+00> : vector<8x8xf32>
    %68 = tpu.matmul %67, %56, %cst_20 {dimension_numbers = #tpu.dot_dimension_numbers<[1], [0], [0], [1], [0, 0, 1, 1], [], []>} : vector<8x8xf32>, vector<8x8xf32>, vector<8x8xf32> -> vector<8x8xf32>
    %69 = tpu.concatenate %23, %38, %53, %68 in 1 : vector<8x8xf32>, vector<8x8xf32>, vector<8x8xf32>, vector<8x8xf32> -> vector<8x32xf32>
    %c0_21 = arith.constant 0 : index
    %c0_22 = arith.constant 0 : index
    %c0_23 = arith.constant 0 : index
    %70 = vector.load %arg3[%c0_21, %c0_22, %c0_23] : memref<1x8x32xf32, #tpu.memory_space<vmem>>, vector<1x8x32xf32>
    %71 = vector.shape_cast %70 : vector<1x8x32xf32> to vector<8x32xf32>
    %72 = vector.shape_cast %69 : vector<8x32xf32> to vector<1x8x32xf32>
    tpu.vector_store %arg3[%c0_21, %c0_22, %c0_23], %72 {strides = array<i32>} : memref<1x8x32xf32, #tpu.memory_space<vmem>>, vector<1x8x32xf32>,
    return
  }
  func.func @transform_0(%arg0: i32) -> (i32, i32, i32) {
    %c0_i32 = arith.constant 0 : i32
    %c0_i32_0 = arith.constant 0 : i32
    %c0_i32_1 = arith.constant 0 : i32
    return %arg0, %c0_i32, %c0_i32_0 : i32, i32, i32
  }
  func.func @transform_1(%arg0: i32) -> (i32, i32) {
    %c0_i32 = arith.constant 0 : i32
    %c0_i32_0 = arith.constant 0 : i32
    %c0_i32_1 = arith.constant 0 : i32
    return %c0_i32, %c0_i32_0 : i32, i32
  }
  func.func @transform_2(%arg0: i32) -> (i32, i32, i32) {
    %c0_i32 = arith.constant 0 : i32
    %c0_i32_0 = arith.constant 0 : i32
    %c0_i32_1 = arith.constant 0 : i32
    return %arg0, %c0_i32, %c0_i32_0 : i32, i32, i32
  }
}

</mosaic_0001>

<bundles_post_ra>
// kernel: tpu_custom_call.1
= control target key start
LH: loop header
LB: loop body
LE: loop exit
PB: predicated region body
PF: predicated region fallthrough
CT: control target
= control target key end

     0   :  { %7 = vsyncpa [#allocation3], 0  ;;  %s1605_s0 = inlined_call_operand.hbm [shape: f32[2,8,32], index: 0, kind: input, shape index: {}]   ;;  %s1606_s1 = inlined_call_operand.hbm [shape: f32[32,96], index: 1, kind: input, shape index: {}]   ;;  %s1607_s2 = inlined_call_operand.hbm [shape: f32[2,8,32], index: 2, kind: output, shape index: {}]  }
   0x1   :  { %9 = vsyncpa [#allocation3 + $0x1], 0 }
   0x2   :  { %10 = vsyncpa [#allocation6], 0 }
   0x3   :  { %11 = vsyncpa [#allocation4], 0 }
   0x4   :  { %13 = vsyncpa [#allocation4 + $0x1], 0  ;;  %s1377_s9 = smov 0   ;;  %s1379_s10 = smov 0  }
   0x5   :  { %s1381_s11 = smov 0   ;;  %s1383_s12 = smov 0  }
   0x6 LB: > { %s1398_s13 = sadd.s32 4294967295, %s1339_s12   ;;  %s1027_s14 = sadd.s32 4294967294, %s1339_s12   ;;  %s1339_s12 = sphi %s1383_s12, %s1629_s12   ;;  %s1335_s11 = sphi %s1381_s11, %s1628_s11   ;;  %s1331_s10 = sphi %s1379_s10, %s1627_s10   ;;  %s1327_s9 = sphi %s1377_s9, %s1626_s9  }
   0x7   : > { %p39_p0 = scmp.ne.s32.totalorder %s1331_s10, %s1327_s9  ;;  %p1608_p1 = scmp.eq.s32.totalorder %s1398_s13, 0 }
   0x8   : > { %p90_p3 = scmp.eq.s32.totalorder %s1027_s14, 1  ;;  %p1028_p5 = scmp.ge.s32.totalorder %s1339_s12, 1 }
   0x9   : > { %p1407_p4 = por %p1608_p1, %p39_p0  ;;  %p97_p7 = scmp.lt.s32.totalorder %s1339_s12, 3 }
   0xa   : > { %p1412_p6 = por %p90_p3, %p39_p0  ;;  %s1341_s18 = smov [#allocation5]  }
   0xb   : > { %s1612_s15 = scalar_select %p1407_p4, 1, 0 }
   0xc   : > { %s1613_s16 = scalar_select %p1412_p6, 1, 0 }
   0xd   : > { %p1417_p8 = pnand %p1028_p5, %p97_p7  ;;  %s109_s19 = sshll.u32 %s1341_s18, 4  ;;  %s110_s19 = int_to_ptr.vmem [resolvable:$true] %s109_s19 }
   0xe   : > { %s1431_s21 = sadd.s32 1, %s1339_s12   ;;  %s26_s22 = sadd.s32 1, %s1335_s11 }
   0xf   : > { %s1614_s17 = scalar_select %p1417_p8, 1, 0 }
  0x10   : > { %p1134_p9 = pneg %p1417_p8  ;;  %s23_s23 = ssub.s32 %s1339_s12, %s1431_s21 }
  0x11   : > { %s1228_s24 = scalar_lea.vmem %s110_s19, 512  ;;  %p1236_p5 = scmp.lt.s32.totalorder %s110_s19, %s110_s19 }
  0x12   : > { %p1426_p11 = pnand %p1134_p9, %p1608_p1  ;;  %p1229_p13 = scmp.ne.s32.totalorder %s110_s19, %s1228_s24 }
  0x13   : > { %p1237_p7 = scmp.lt.s32.totalorder %s1228_s24, %s1228_s24 }
  0x14   : > { %p1219_p12 = pneg %p1426_p11 }
  0x15   : > { %p1238_p10 = por %p1237_p7, %p1236_p5 }
  0x16   : > { %p1231_p0 = pnand %p1229_p13, %p1219_p12 }
  0x18   : > { %p1232_p3 = pneg %p1231_p0 }
  0x1a   : > { %p1239_p2 = pnand %p1238_p10, %p1232_p3 }
  0x1c   : > { %1242 = shalt.err (!%p1239_p2)
}
  0x1d   : > { %s1342_s25 = smov 128   ;;  %s1343_s26 = smov 8  }
  0x1e   : > { %1137 = dma.hbm_to_vmem [thread:$0]  (!%p1426_p11), %s1606_s1, 512, %s110_s19, [#allocation6], %s1342_s25, %s1342_s25, %s1343_s26  }
  0x1f   : > { %p24_p9 = scmp.eq.s32.totalorder %s23_s23, 0  ;;  %p33_p12 = scmp.ne.s32.totalorder %s1335_s11, %s1331_s10 }
  0x20   : > { %p34_p10 = scmp.eq.s32.totalorder %s1339_s12, 0  ;;  %p1147_p2 = scmp.lt.s32.totalorder %s1339_s12, 2 }
  0x21   : > { %s1448_s29 = scalar_select %p24_p9, %s1335_s11, %s26_s22  }
  0x22   : > { %p35_p13 = por %p34_p10, %p33_p12  ;;  %p1616_p0 = scmp.eq.s32.totalorder %s1398_s13, 1 }
  0x23   : > { %s123_s3 = sand.u32 1, %s1335_s11   ;;  %s1032_s4 = sshll.u32 %s1339_s12, 7 }
  0x24   : > { %p1452_p3 = por %p1616_p0, %p33_p12  ;;  %s1031_s5 = sshll.u32 %s123_s3, 3 }
  0x25   : > { %s1461_s8 = scalar_lea.hbm %s1605_s0, %s1032_s4  ;;  %s127_s14 = scalar_lea.vmem [#allocation2], %s1031_s5 }
  0x26   : > { %s1617_s30 = scalar_select %p1452_p3, 1, 0 }
  0x27   : > { %s134_s18 = sshll.u32 %s127_s14, 4  ;;  %p1463_p11 = pnand %p1147_p2, %p35_p13  ;;  %s135_s18 = int_to_ptr.vmem [resolvable:$true] %s134_s18 }
  0x28   : > { %s124_s20 = scalar_lea.sflag [#allocation3], %s123_s3  ;;  %s1243_s22 = scalar_lea.hbm %s1461_s8, 128 }
  0x29   : > { %p1244_p5 = scmp.ne.s32.totalorder %s1461_s8, %s1243_s22  ;;  %p1245_p7 = pneg %p1463_p11 }
  0x2a   : > { %s1248_s25 = scalar_lea.hbm %s1605_s0, 256  ;;  %p1249_p10 = scmp.lt.s32.totalorder %s1461_s8, %s1605_s0 }
  0x2b   : > { %p1246_p9 = pnand %p1245_p7, %p1244_p5  ;;  %p1250_p2 = scmp.lt.s32.totalorder %s1248_s25, %s1243_s22 }
  0x2d   : > { %p1247_p12 = pneg %p1246_p9  ;;  %p1251_p13 = por %p1250_p2, %p1249_p10 }
  0x2f   : > { %p1252_p0 = pnand %p1251_p13, %p1247_p12 }
  0x31   : > { %1255 = shalt.err (!%p1252_p0)
}
  0x32   : > { %s1256_s28 = scalar_lea.vmem %s135_s18, 128  ;;  %s1344_s3 = smov [#allocation2]  }
  0x33   : > { %p1257_p1 = scmp.ne.s32.totalorder %s135_s18, %s1256_s28  ;;  %s1261_s4 = sshll.u32 %s1344_s3, 4  ;;  %s1262_s4 = int_to_ptr.vmem [resolvable:$false] %s1261_s4 }
  0x34   : > { %s1263_s5 = scalar_lea.vmem %s1262_s4, 256  ;;  %p1264_p5 = scmp.lt.s32.totalorder %s135_s18, %s1262_s4 }
  0x35   : > { %p1259_p6 = pnand %p1257_p1, %p1245_p7  ;;  %p1265_p9 = scmp.lt.s32.totalorder %s1263_s5, %s1256_s28 }
  0x37   : > { %p1260_p3 = pneg %p1259_p6  ;;  %p1266_p4 = por %p1265_p9, %p1264_p5 }
  0x39   : > { %p1267_p8 = pnand %p1266_p4, %p1260_p3 }
  0x3b   : > { %1270 = shalt.err (!%p1267_p8)
}
  0x3c   : > { %1141 = dma.hbm_to_vmem [thread:$0]  (!%p1463_p11), %s1461_s8, 128, %s135_s18, %s124_s20  }
  0x3d   : > { %p1619_p12 = scmp.ne.s32.totalorder %s1614_s17, 0 }
  0x3e   : > { %s1484_s6 = sand.u32 (!%p1619_p12), 1, %s1331_s10   ;;  %p1620_p1 = scmp.ne.s32.totalorder (!%p1619_p12), %s1612_s15, 0 }
  0x3f   : > { %143 = sbr.rel (%p1619_p12) target bundleno = 1277 (0x4fd), region = 28  ;;  %s1034_s7 = sshll.u32 (!%p1619_p12), %s1484_s6, 3 }
  0x40   : > { %s146_s14 = scalar_lea.sflag (!%p1619_p12), [#allocation3], %s1484_s6  ;;  %s149_s22 = scalar_lea.vmem (!%p1619_p12), [#allocation2], %s1034_s7 }
  0x44   : > { %1314 = dma.done.wait (%p1620_p1), %s146_s14, 128  }
  0x45   : > { %1316 = vsyncadd (%p1620_p1), %s146_s14, 4294967168  ;;  %p1621_p4 = scmp.eq.s32.totalorder %s1398_s13, 0 }
  0x47   : > { %1318 = dma.done.wait (%p1621_p4), [#allocation6], 512   ;;  %p1622_p6 = pmov %p1621_p4 }
  0x48   : > { %v1345_v0 = vmov 0.0   ;;  %vm1346_vm0 = vmmov 0   ;;  %v178_v1 = vld [vmem:[#allocation5 + $0x18] sm:$0xff]  ;;  %v177_v2 = vld [vmem:[#allocation5 + $0x10] sm:$0xff]  ;;  %v176_v3 = vld [vmem:[#allocation5 + $0x8] sm:$0xff]  ;;  %vm179_vm1 = vcmask 261120  }
  0x49   : > { %1320 = vsyncadd (%p1622_p6), [#allocation6], 4294966784  ;;  %1075 = vmatprep.subr.mxu0 %v1345_v0  ;;  %1083 = vmatprep.mubr.msk.f32.mxu0 %vm1346_vm0, %v1345_v0  ;;  %v175_v4 = vld [vmem:[#allocation5] sm:$0xff]  ;;  %v174_v5 = vld [vmem:[%s149_s22] sm:$0xff]  ;;  %s1347_s15 = smov 96   ;;  %s1348_s17 = smov 120  }
  0x4a   : > { %1086 = vmatprep.subr.mxu1 %v1345_v0  ;;  %1088 = vmatprep.mubr.msk.f32.mxu1 %vm1346_vm0, %v1345_v0  ;;  %s1349_s8 = smov 88   ;;  %s1350_s18 = smov 80   ;;  %vm257_vm2 = vcmask 64512   ;;  %vm928_vm3 = vcmask 130048   ;;  %vm930_vm4 = vcmask 195584  }
  0x4b   : > { %1076 = vmatpush3.msra.mxu0 %v178_v1  ;;  %s1351_s19 = smov 112   ;;  %s1352_s20 = smov 72  }
  0x4c   : > { %1077 = vmatprep.subr.mxu0 %v1345_v0  ;;  %s1353_s23 = smov 104   ;;  %s1354_s24 = smov 56  }
  0x4d   : > { %1078 = vmatpush3.msra.mxu0 %v177_v2  ;;  %s1355_s25 = smov 64   ;;  %s1356_s26 = smov 48  }
  0x4e   : > { %1079 = vmatprep.subr.mxu0 %v1345_v0  ;;  %s1357_s27 = smov 40   ;;  %s1358_s28 = smov 8  }
  0x4f   : > { %1080 = vmatpush3.msra.mxu0 %v176_v3  ;;  %s1359_s3 = smov 16   ;;  %s1360_s4 = smov 24  }
  0x50   : > { %1081 = vmatprep.subr.mxu0 %v1345_v0  ;;  %s1051_s5 = sshll.u32 %s1398_s13, 7  ;;  %s173_s14 = scalar_lea.vmem [#allocation7], %s1034_s7 }
  0x51   : > { %1082 = vmatpush3.msra.mxu0 %v175_v4  ;;  %s947_s22 = sshll.u32 %s173_s14, 4  ;;  %p1623_p3 = scmp.ne.s32.totalorder %s1617_s30, 0  ;;  %s948_s22 = int_to_ptr.vmem [resolvable:$true] %s947_s22 }
  0x52   : > { %1084 = vmatmul.mubr.msk.f32.vlgmr.msra.gmra.mxu0 %vm179_vm1, %v174_v5  ;;  %1096 = vmatprep.subr.mxu0 %v1345_v0  ;;  %s1361_s13 = smov [#allocation7]  }
  0x53   : > { %1098 = vmatprep.mubr.msk.f32.mxu0 %vm1346_vm0, %v1345_v0  ;;  %s1275_s7 = sshll.u32 %s1361_s13, 4  ;;  %s1276_s7 = int_to_ptr.vmem [resolvable:$false] %s1275_s7 }
  0x54   : > { %p1278_p10 = scmp.lt.s32.totalorder %s948_s22, %s1276_s7 }
 0x112   : > { %v1511_v6 = vpop.f32.mrf.mxu0 }
 0x113   : > { %255 = vrot.lane.b32.xlu0 %v1511_v6, %s1347_s15  ;;  %v253_v7 = vmul.f32 0.35355338, %v1511_v6 }
 0x114   : > { %v1085_v8 = vpop.f32.mrf.mxu0 }
 0x115   : > { %420 = vrot.lane.b32.xlu1 %v253_v7, %s1348_s17 }
 0x117   : > { %422 = vrot.lane.b32.xlu0 %v1511_v6, %s1349_s8  ;;  %s1567_s8 = scalar_lea.hbm %s1607_s2, %s1051_s5 }
 0x119   : > { %587 = vrot.lane.b32.xlu1 %v1511_v6, %s1350_s18  ;;  %s934_s18 = scalar_lea.sflag [#allocation4], %s1484_s6 }
 0x11b   : > { %585 = vrot.lane.b32.xlu0 %v253_v7, %s1351_s19  ;;  %s1271_s19 = scalar_lea.vmem %s948_s22, 128 }
 0x11c   : > { %p1272_p8 = scmp.ne.s32.totalorder %s948_s22, %s1271_s19 }
 0x11d   : > { %752 = vrot.lane.b32.xlu1 %v1511_v6, %s1352_s20  ;;  %s1277_s20 = scalar_lea.vmem %s1276_s7, 256 }
 0x11e   : > { %p1273_p11 = pnand %p1272_p8, %p1623_p3  ;;  %p1279_p2 = scmp.lt.s32.totalorder %s1277_s20, %s1271_s19 }
 0x11f   : > { %750 = vrot.lane.b32.xlu0 %v253_v7, %s1353_s23 }
 0x120   : > { %p1274_p7 = pneg %p1273_p11  ;;  %p1280_p13 = por %p1279_p2, %p1278_p10 }
 0x122   : > { %p1281_p0 = pnand %p1280_p13, %p1274_p7 }
 0x185   : > { %v256_v9 = vpop.permute.xlu0 %255 }
 0x186   : > { %1087 = vmatpush3.xpose.msk.msra.mxu1 %vm257_vm2, %v256_v9 }
 0x187   : > { %v421_v10 = vpop.permute.xlu1 %420  ;;  %1091 = vmatprep.subr.mxu1 %v1345_v0 }
 0x189   : > { %v423_v11 = vpop.permute.xlu0 %422  ;;  %1089 = vmatmul.mubr.msk.f32.vlgmr.msra.gmra.mxu1 %vm257_vm2, %v253_v7 }
 0x18a   : > { %1097 = vmatpush3.xpose.msk.msra.mxu0 %vm257_vm2, %v423_v11  ;;  %1093 = vmatprep.mubr.msk.f32.mxu1 %vm1346_vm0, %v1345_v0 }
 0x18b   : > { %v588_v12 = vpop.permute.xlu1 %587  ;;  %1106 = vmatprep.subr.mxu0 %v1345_v0 }
 0x18d   : > { %1099 = vmatmul.mubr.msk.f32.vlgmr.msra.gmra.mxu0 %vm257_vm2, %v421_v10  ;;  %v586_v13 = vpop.permute.xlu0 %585 }
 0x18e   : > { %1107 = vmatpush3.xpose.msk.msra.mxu0 %vm257_vm2, %v588_v12  ;;  %1108 = vmatprep.mubr.msk.f32.mxu0 %vm1346_vm0, %v1345_v0 }
 0x18f   : > { %1116 = vmatprep.subr.mxu0 %v1345_v0  ;;  %v753_v14 = vpop.permute.xlu1 %752 }
 0x191   : > { %1109 = vmatmul.mubr.msk.f32.vlgmr.msra.gmra.mxu0 %vm257_vm2, %v586_v13  ;;  %v751_v15 = vpop.permute.xlu0 %750 }
 0x192   : > { %1117 = vmatpush3.xpose.msk.msra.mxu0 %vm257_vm2, %v753_v14  ;;  %1118 = vmatprep.mubr.msk.f32.mxu0 %vm1346_vm0, %v1345_v0 }
 0x195   : > { %1119 = vmatmul.mubr.msk.f32.vlgmr.msra.gmra.mxu0 %vm257_vm2, %v751_v15 }
 0x249   : > { %v329_v16 = vpop.f32.mrf.mxu1 }
 0x24a   : > { %v333_v17 = vsel %vm257_vm2, %v329_v16, -inf }
 0x24b   : > { %334 = vmax.xlane.f32.xlu1 %v333_v17  ;;  %v1090_v18 = vpop.f32.mrf.mxu1 }
 0x24d   : > { %v494_v19 = vpop.f32.mrf.mxu0 }
 0x24e   : > { %v498_v20 = vsel %vm257_vm2, %v494_v19, -inf }
 0x24f   : > { %499 = vmax.xlane.f32.xlu0 %v498_v20  ;;  %v1100_v21 = vpop.f32.mrf.mxu0 }
 0x251   : > { %v659_v22 = vpop.f32.mrf.mxu0 }
 0x252   : > { %v663_v23 = vsel %vm257_vm2, %v659_v22, -inf }
 0x253   : > { %664 = vmax.xlane.f32.xlu0 %v663_v23  ;;  %v1110_v24 = vpop.f32.mrf.mxu0 }
 0x255   : > { %v824_v25 = vpop.f32.mrf.mxu0 }
 0x256   : > { %v828_v26 = vsel %vm257_vm2, %v824_v25, -inf }
 0x257   : > { %829 = vmax.xlane.f32.xlu1 %v828_v26  ;;  %v1120_v27 = vpop.f32.mrf.mxu0 }
 0x268   : > { %509 = vrot.lane.b32.xlu1 %v1511_v6, %s1354_s24 }
 0x2d4   : > { %v335_v28 = vpop.xlane.xlu1 %334 }
 0x2d5   : > { %v336_v29 = vsub.f32 %v329_v16, %v335_v28 }
 0x2d7   : > { %v337_v30 = vmul.f32 1.442695, %v336_v29 }
 0x2d8   : > { %v500_v31 = vpop.xlane.xlu0 %499 }
 0x2d9   : > { %1201 = vpow2.f32 %v337_v30  ;;  %v501_v32 = vsub.f32 %v494_v19, %v500_v31 }
 0x2db   : > { %v502_v33 = vmul.f32 1.442695, %v501_v32 }
 0x2dc   : > { %v665_v43 = vpop.xlane.xlu0 %664 }
 0x2dd   : > { %1203 = vpow2.f32 %v502_v33  ;;  %v666_v44 = vsub.f32 %v659_v22, %v665_v43 }
 0x2df   : > { %v667_v45 = vmul.f32 1.442695, %v666_v44 }
 0x2e0   : > { %v830_v34 = vpop.xlane.xlu1 %829 }
 0x2e1   : > { %v831_v35 = vsub.f32 %v824_v25, %v830_v34 }
 0x2e3   : > { %v832_v36 = vmul.f32 1.442695, %v831_v35 }
 0x2e4   : > { %v510_v48 = vpop.permute.xlu1 %509 }
 0x2e5   : > { %1205 = vpow2.f32 %v832_v36 }
 0x2e6   : > { %v1202_v37 = vpop.eup %1201  ;;  %1207 = vpow2.f32 %v667_v45 }
 0x2e7   : > { %v339_v38 = vsel %vm257_vm2, %v1202_v37, 0.0 }
 0x2e8   : > { %340 = vadd.xlane.f32.xlu0 %v339_v38 }
 0x2ea   : > { %v1204_v39 = vpop.eup %1203 }
 0x2eb   : > { %v504_v40 = vsel %vm257_vm2, %v1204_v39, 0.0 }
 0x2ec   : > { %505 = vadd.xlane.f32.xlu1 %v504_v40 }
 0x2f2   : > { %v1206_v41 = vpop.eup %1205 }
 0x2f3   : > { %v834_v42 = vsel %vm257_vm2, %v1206_v41, 0.0  ;;  %v1208_v46 = vpop.eup %1207 }
 0x2f4   : > { %835 = vadd.xlane.f32.xlu1 %v834_v42  ;;  %v669_v47 = vsel %vm257_vm2, %v1208_v46, 0.0 }
 0x2fe   : > { %344 = vrot.lane.b32.xlu0 %v1511_v6, %s1355_s25 }
 0x305   : > { %674 = vrot.lane.b32.xlu1 %v1511_v6, %s1356_s26 }
 0x31d   : > { %670 = vadd.xlane.f32.xlu0 %v669_v47 }
 0x333   : > { %839 = vrot.lane.b32.xlu0 %v1511_v6, %s1357_s27 }
 0x371   : > { %v341_v49 = vpop.xlane.xlu0 %340 }
 0x372   : > { %1209 = vrcp.f32 %v341_v49 }
 0x375   : > { %v345_v50 = vpop.permute.xlu0 %344  ;;  %v506_v51 = vpop.xlane.xlu1 %505 }
 0x376   : > { %1211 = vrcp.f32 %v506_v51  ;;  %1092 = vmatpush3.msra.mxu1 %v345_v50 }
 0x377   : > { %1101 = vmatprep.subr.mxu1 %v1345_v0 }
 0x37d   : > { %v836_v53 = vpop.xlane.xlu1 %835 }
 0x37f   : > { %v1210_v52 = vpop.eup %1209 }
 0x380   : > { %v343_v54 = vmul.f32 %v1210_v52, %v1202_v37 }
 0x381   : > { %v675_v57 = vpop.permute.xlu1 %674 }
 0x382   : > { %1094 = vmatmul.mubr.msk.f32.vlgmr.msra.gmra.mxu1 %vm257_vm2, %v343_v54 }
 0x383   : > { %v1212_v55 = vpop.eup %1211  ;;  %1102 = vmatpush3.msra.mxu1 %v510_v48  ;;  %1103 = vmatprep.mubr.msk.f32.mxu1 %vm1346_vm0, %v1345_v0 }
 0x384   : > { %1111 = vmatprep.subr.mxu1 %v1345_v0  ;;  %v508_v56 = vmul.f32 %v1212_v55, %v1204_v39 }
 0x386   : > { %1104 = vmatmul.mubr.msk.f32.vlgmr.msra.gmra.mxu1 %vm257_vm2, %v508_v56 }
 0x387   : > { %1112 = vmatpush3.msra.mxu1 %v675_v57  ;;  %1113 = vmatprep.mubr.msk.f32.mxu1 %vm1346_vm0, %v1345_v0 }
 0x388   : > { %1121 = vmatprep.subr.mxu1 %v1345_v0 }
 0x3a6   : > { %v671_v58 = vpop.xlane.xlu0 %670 }
 0x3a7   : > { %1213 = vrcp.f32 %v671_v58 }
 0x3a8   : > { %1215 = vrcp.f32 %v836_v53 }
 0x3aa   : > { %v840_v62 = vpop.permute.xlu0 %839 }
 0x3b4   : > { %v1214_v59 = vpop.eup %1213 }
 0x3b5   : > { %v673_v60 = vmul.f32 %v1214_v59, %v1208_v46  ;;  %v1216_v61 = vpop.eup %1215 }
 0x3b6   : > { %v838_v63 = vmul.f32 %v1216_v61, %v1206_v41 }
 0x3b7   : > { %1114 = vmatmul.mubr.msk.f32.vlgmr.msra.gmra.mxu1 %vm257_vm2, %v673_v60 }
 0x3b8   : > { %1122 = vmatpush3.msra.mxu1 %v840_v62  ;;  %1123 = vmatprep.mubr.msk.f32.mxu1 %vm1346_vm0, %v1345_v0 }
 0x3bb   : > { %1124 = vmatmul.mubr.msk.f32.vlgmr.msra.gmra.mxu1 %vm257_vm2, %v838_v63 }
 0x442   : > { %v416_v1 = vpop.f32.mrf.mxu1 }
 0x444   : > { %v1095_v2 = vpop.f32.mrf.mxu1 }
 0x446   : > { %v581_v3 = vpop.f32.mrf.mxu1 }
 0x447   : > { %916 = vrot.lane.b32.xlu1 %v581_v3, %s1358_s28 }
 0x448   : > { %v1105_v4 = vpop.f32.mrf.mxu1 }
 0x477   : > { %v746_v5 = vpop.f32.mrf.mxu1 }
 0x478   : > { %920 = vrot.lane.b32.xlu0 %v746_v5, %s1359_s3 }
 0x479   : > { %v1115_v6 = vpop.f32.mrf.mxu1 }
 0x47b   : > { %v911_v7 = vpop.f32.mrf.mxu1 }
 0x47c   : > { %924 = vrot.lane.b32.xlu1 %v911_v7, %s1360_s4 }
 0x47d   : > { %v1125_v0 = vpop.f32.mrf.mxu1 }
 0x4b9   : > { %v917_v8 = vpop.permute.xlu1 %916 }
 0x4ba   : > { %v927_v10 = vsel %vm257_vm2, %v416_v1, %v917_v8 }
 0x4ea   : > { %v921_v9 = vpop.permute.xlu0 %920 }
 0x4eb   : > { %v929_v11 = vsel %vm928_vm3, %v927_v10, %v921_v9 }
 0x4ee   : > { %v925_v12 = vpop.permute.xlu1 %924 }
 0x4ef   : > { %v931_v13 = vsel %vm930_vm4, %v929_v11, %v925_v12 }
 0x4f0   : > { %932 = vst.msk [vmem:[%s173_s14] sm:$0xff] %vm179_vm1, %v931_v13 }
 0x4f1   : > { %1284 = shalt.err (!%p1281_p0)
}
 0x4f2   : > { %s1285_s23 = scalar_lea.hbm %s1567_s8, 128  ;;  %s1289_s25 = scalar_lea.hbm %s1607_s2, 256 }
 0x4f3   : > { %p1286_p5 = scmp.ne.s32.totalorder %s1567_s8, %s1285_s23  ;;  %p1290_p1 = scmp.lt.s32.totalorder %s1567_s8, %s1607_s2 }
 0x4f4   : > { %p1291_p4 = scmp.lt.s32.totalorder %s1289_s25, %s1285_s23 }
 0x4f5   : > { %p1287_p9 = pnand %p1286_p5, %p1623_p3 }
 0x4f6   : > { %p1292_p6 = por %p1291_p4, %p1290_p1 }
 0x4f7   : > { %p1288_p12 = pneg %p1287_p9 }
 0x4f9   : > { %p1293_p8 = pnand %p1292_p6, %p1288_p12 }
 0x4fb   : > { %1296 = shalt.err (!%p1293_p8)
}
 0x4fc   : > { %1132 = dma.vmem_to_hbm [thread:$0]  (%p1623_p3), %s948_s22, 128, %s1567_s8, %s934_s18  }
 0x4fd PF: > { %s959_s28 = sand.u32 1, %s1327_s9   ;;  %p1624_p11 = scmp.ne.s32.totalorder %s1613_s16, 0 }
 0x4fe   : > { %p1625_p7 = scmp.ge.s32.totalorder %s1339_s12, 2  ;;  %s960_s3 = scalar_lea.sflag [#allocation4], %s959_s28 }
 0x500   : > { %p1143_p10 = pnand %p1625_p7, %p1624_p11 }
 0x502   : > { %p1144_p2 = pneg %p1143_p10 }
 0x504   : > { %1322 = dma.done.wait (%p1144_p2), %s960_s3, 128  }
 0x505   : > { %1324 = vsyncadd (%p1144_p2), %s960_s3, 4294967168  ;;  %p16_p13 = scmp.ge.s32.totalorder %s1431_s21, 4   ;;  %s1626_s9 = smov %s1331_s10 }
 0x506   : > { %s1627_s10 = smov %s1335_s11  ;;  %s1628_s11 = smov %s1448_s29 }
 0x507   : > { %s1629_s12 = smov %s1431_s21  ;;  %18 = sbr.rel (!%p16_p13) target bundleno = 6 (0x6), region = 77 }
 0x50c   :  { %965 = vsyncpa [#allocation3], 1 }
 0x50d   :  { %967 = vsyncpa [#allocation3 + $0x1], 1 }
 0x50e   :  { %968 = vsyncpa [#allocation6], 1 }
 0x50f   :  { %969 = vsyncpa [#allocation4], 1 }
 0x510   :  { %971 = vsyncpa [#allocation4 + $0x1], 1 }

</bundles_post_ra>
